<compile_context>
chip_gen: v7x
topology: tpu7x:2x2x1
jax: 0.10.0
libtpu: 0.0.40
codegen_flags: <defaults>
</compile_context>

<pallas_src>
from functools import partial

import jax
import jax.numpy as jnp
from jax.experimental import pallas as pl
from jax.experimental.pallas import tpu as pltpu


# --------------------------- fused forward kernel ---------------------------
def _fused_loss_kernel(a_ref, p_ref, n_ref, w1_ref, pk_ref, idxlam_ref,
                       out_ref, *, B, margin, eps):
    N = 3 * B                                # rows of x_i = anchor|pos|neg

    # ---- in-kernel concat (no host concat / extra HBM round trip) ----
    x_i = jnp.concatenate([a_ref[...], p_ref[...], n_ref[...]], axis=0)  # (N, D)

    w1 = w1_ref[...]                         # (D, H)
    b1 = pk_ref[0:1, :]                      # (1, H)
    w2r = pk_ref[1:2, :]                     # (1, H)  lane-dense score weights
    b2 = pk_ref[2:3, 0:1]                    # (1, 1)

    idx = idxlam_ref[:, 0:1].astype(jnp.int32)   # (N, 1) permutation indices
    lam = idxlam_ref[:, 1:2]                     # (N, 1) mixup lambdas

    # ---- permutation as an in-kernel one-hot matmul (tiny N; use a
    #      scalar-prefetch gather instead when N grows) ----
    cols = jax.lax.broadcasted_iota(jnp.int32, (N, N), 1)
    P = (cols == idx).astype(jnp.float32)                            # (N, N)
    x_j = jnp.dot(P, x_i, preferred_element_type=jnp.float32)        # (N, D)

    # ---- mixup (needs only x_i / x_j) ----
    x_tilde = x_i * lam + x_j * (1.0 - lam)                          # (N, D)

    # ---- ONE fused W1 matmul for all basenet evaluations ----
    # basenet is rowwise, so score(x_j) from this stacked pass equals the
    # permuted score_i exactly; no separate P @ emb_i matmul needed.
    X = jnp.concatenate([x_i, x_j, x_tilde], axis=0)                 # (3N, D)
    E = jnp.maximum(
        jnp.dot(X, w1, preferred_element_type=jnp.float32) + b1, 0.0)  # (3N, H)
    s = jnp.tanh(jnp.sum(E * w2r, axis=1, keepdims=True) + b2)       # (3N, 1)

    emb_i = E[0:N]                           # (N, H)
    score_i = s[0:N]
    score_xj = s[N:2 * N]
    score_tilde = s[2 * N:3 * N]

    # ---- triplet margin loss + L2 reg on sublane-aligned row slices ----
    a_emb = emb_i[0:B]
    p_emb = emb_i[B:2 * B]
    n_emb = emb_i[2 * B:3 * B]
    d_ap = jnp.sqrt(jnp.sum((a_emb - p_emb + eps) ** 2, axis=1, keepdims=True))
    d_an = jnp.sqrt(jnp.sum((a_emb - n_emb + eps) ** 2, axis=1, keepdims=True))
    loss_emb = jnp.sum(jnp.maximum(d_ap - d_an + margin, 0.0)) / B
    l2_reg = jnp.sqrt(jnp.sum((a_emb + p_emb + n_emb) ** 2))

    # ---- targets synthesized from an iota; permuted target via idx ----
    rows = jax.lax.broadcasted_iota(jnp.int32, (N, 1), 0)
    target_i = jnp.where(rows < 2 * B, -1.0, 1.0)                    # (N, 1)
    target_j = jnp.where(idx < 2 * B, -1.0, 1.0)                     # target_i[idx]

    y_tilde = target_i * lam + target_j * (1.0 - lam)
    s_mix = score_i * lam + score_xj * (1.0 - lam)

    def smooth_l1(a, b):                     # SmoothL1, beta = 1.0
        d = a - b
        ad = jnp.abs(d)
        return jnp.where(ad < 1.0, 0.5 * d * d, ad - 0.5)

    loss_out = jnp.sum(smooth_l1(score_tilde, y_tilde)) / N
    loss_intra = jnp.sum(smooth_l1(score_tilde, s_mix)) / N

    out_ref[0] = loss_emb
    out_ref[1] = l2_reg
    out_ref[2] = loss_out
    out_ref[3] = loss_intra


# ------------------------------ full forward --------------------------------
def rosas_loss(params, anchor, pos, neg, pre_emb_loss, pre_score_loss, key,
               *, margin=1.0, alpha=1.0, T=2.0, l2_reg_weight=0.0):
    w1, b1, w2, b2 = params
    B = anchor.shape[0]
    N = 3 * B
    H = w1.shape[1]

    # TODO(synk): torch.randperm / Dirichlet(Beta) sampling have no Pallas
    # equivalent; generated here with jax.random (deterministic glue).
    kperm, kbeta = jax.random.split(key)
    indices_j = jax.random.permutation(kperm, N).astype(jnp.float32).reshape(N, 1)
    lambdas = jax.random.beta(kbeta, alpha, alpha, shape=(N, 1)).astype(jnp.float32)
    idxlam = jnp.concatenate([indices_j, lambdas], axis=1)           # (N, 2)

    # pack b1 / w2_row / b2 into one (3, H) VMEM block (fewer tiny DMAs)
    packed = jnp.concatenate(
        [b1.reshape(1, H).astype(jnp.float32),
         w2.reshape(1, H).astype(jnp.float32),
         jnp.broadcast_to(b2.reshape(1, 1).astype(jnp.float32), (1, H))],
        axis=0)                                                      # (3, H)

    vmem = pl.BlockSpec(memory_space=pltpu.MemorySpace.VMEM)
    smem = pl.BlockSpec(memory_space=pltpu.MemorySpace.SMEM)

    scal = pl.pallas_call(
        partial(_fused_loss_kernel, B=B, margin=float(margin), eps=1e-6),
        out_shape=jax.ShapeDtypeStruct((4,), jnp.float32),
        in_specs=[vmem, vmem, vmem, vmem, vmem, vmem],
        out_specs=smem,
    )(anchor.astype(jnp.float32), pos.astype(jnp.float32),
      neg.astype(jnp.float32), w1.astype(jnp.float32), packed, idxlam)

    loss_emb, l2_reg = scal[0], scal[1]
    loss_out, loss_intra = scal[2], scal[3]
    loss_score = loss_out + loss_intra          # mean(a+b) == mean(a)+mean(b)

    # k1/k2 weighting — jnp.where keeps this jit-safe for traced pre_* scalars
    # (the original Python `if pre != 0` breaks under tracing).
    pre_emb = jnp.asarray(pre_emb_loss, jnp.float32)
    pre_score = jnp.asarray(pre_score_loss, jnp.float32)
    t = jnp.float32(T)
    k1 = jnp.where(pre_emb != 0,
                   jnp.exp(loss_emb / jnp.where(pre_emb != 0, pre_emb, 1.0) / t),
                   0.0)
    k2 = jnp.where(pre_score != 0,
                   jnp.exp(loss_score / jnp.where(pre_score != 0, pre_score, 1.0) / t),
                   0.0)
    denom = k1 + k2
    denom = jnp.where(denom != 0, denom, 1.0)   # guard 0/0 when both pre_* == 0
    loss = (k1 / denom * loss_emb
            + k2 / denom * loss_score
            + l2_reg_weight * l2_reg)
    return loss, loss_emb, loss_score, loss_out, loss_intra


# ---------------------------------- main -------------------------------------
if __name__ == "__main__":
    key = jax.random.PRNGKey(0)
    kw1, kw2, ka, kp, kn, kloss = jax.random.split(key, 6)

    # B=8 keeps all in-kernel row slices sublane(8)-aligned.
    B, D, H = 8, 32, 32
    w1 = jax.random.normal(kw1, (D, H), jnp.float32) * 0.1
    b1 = jnp.zeros((1, H), jnp.float32)
    w2 = jax.random.normal(kw2, (H, 1), jnp.float32) * 0.1
    b2 = jnp.zeros((1, 1), jnp.float32)

    anchor = jax.random.normal(ka, (B, D), jnp.float32)
    pos = jax.random.normal(kp, (B, D), jnp.float32)
    neg = jax.random.normal(kn, (B, D), jnp.float32) + 1.0

    outs = rosas_loss((w1, b1, w2, b2), anchor, pos, neg,
                      pre_emb_loss=1.0, pre_score_loss=1.0, key=kloss,
                      margin=1.0, alpha=1.0, T=2.0, l2_reg_weight=0.0)
    jax.block_until_ready(outs[0])
    print("KERNEL_OK")
</pallas_src>

<mosaic_0001>
module attributes {stable_mosaic.version = 11 : i64} {
  func.func @_fused_loss_kernel(%arg0: memref<8x32xf32, #tpu.memory_space<vmem>>, %arg1: memref<8x32xf32, #tpu.memory_space<vmem>>, %arg2: memref<8x32xf32, #tpu.memory_space<vmem>>, %arg3: memref<32x32xf32, #tpu.memory_space<vmem>>, %arg4: memref<3x32xf32, #tpu.memory_space<vmem>>, %arg5: memref<24x2xf32, #tpu.memory_space<vmem>>, %arg6: memref<4xf32, #tpu.memory_space<smem>>) attributes {dimension_semantics = [], scalar_prefetch = 0 : i64, scratch_operands = 0 : i64, tpu.core_type = #tpu.core_type<tc>} {
    %c0 = arith.constant 0 : index
    %c0_0 = arith.constant 0 : index
    %0 = vector.load %arg0[%c0, %c0_0] : memref<8x32xf32, #tpu.memory_space<vmem>>, vector<8x32xf32>
    %c0_1 = arith.constant 0 : index
    %c0_2 = arith.constant 0 : index
    %1 = vector.load %arg1[%c0_1, %c0_2] : memref<8x32xf32, #tpu.memory_space<vmem>>, vector<8x32xf32>
    %c0_3 = arith.constant 0 : index
    %c0_4 = arith.constant 0 : index
    %2 = vector.load %arg2[%c0_3, %c0_4] : memref<8x32xf32, #tpu.memory_space<vmem>>, vector<8x32xf32>
    %3 = tpu.concatenate %0, %1, %2 in 0 : vector<8x32xf32>, vector<8x32xf32>, vector<8x32xf32> -> vector<24x32xf32>
    %c0_5 = arith.constant 0 : index
    %c0_6 = arith.constant 0 : index
    %4 = vector.load %arg3[%c0_5, %c0_6] : memref<32x32xf32, #tpu.memory_space<vmem>>, vector<32x32xf32>
    %c0_7 = arith.constant 0 : index
    %c0_8 = arith.constant 0 : index
    %5 = vector.load %arg4[%c0_7, %c0_8] : memref<3x32xf32, #tpu.memory_space<vmem>>, vector<1x32xf32>
    %c1 = arith.constant 1 : index
    %c0_9 = arith.constant 0 : index
    %6 = vector.load %arg4[%c1, %c0_9] : memref<3x32xf32, #tpu.memory_space<vmem>>, vector<1x32xf32>
    %c2 = arith.constant 2 : index
    %c0_10 = arith.constant 0 : index
    %7 = vector.load %arg4[%c2, %c0_10] : memref<3x32xf32, #tpu.memory_space<vmem>>, vector<1x1xf32>
    %c0_11 = arith.constant 0 : index
    %c0_12 = arith.constant 0 : index
    %8 = vector.load %arg5[%c0_11, %c0_12] : memref<24x2xf32, #tpu.memory_space<vmem>>, vector<24x1xf32>
    %9 = arith.fptosi %8 : vector<24x1xf32> to vector<24x1xi32>
    %c0_13 = arith.constant 0 : index
    %c1_14 = arith.constant 1 : index
    %10 = vector.load %arg5[%c0_13, %c1_14] : memref<24x2xf32, #tpu.memory_space<vmem>>, vector<24x1xf32>
    %11 = tpu.iota {dimensions = array<i32: 1>} : vector<24x24xi32>
    %12 = vector.broadcast %9 : vector<24x1xi32> to vector<24x24xi32>
    %13 = arith.cmpi eq, %11, %12 : vector<24x24xi32>
    %14 = arith.extui %13 : vector<24x24xi1> to vector<24x24xi32>
    %15 = arith.sitofp %14 : vector<24x24xi32> to vector<24x24xf32>
    %cst = arith.constant dense<0.000000e+00> : vector<24x32xf32>
    %16 = tpu.matmul %15, %3, %cst {dimension_numbers = #tpu.dot_dimension_numbers<[1], [0], [0], [1], [0, 0, 1, 1], [], []>} : vector<24x24xf32>, vector<24x32xf32>, vector<24x32xf32> -> vector<24x32xf32>
    %17 = vector.broadcast %10 : vector<24x1xf32> to vector<24x32xf32>
    %18 = arith.mulf %3, %17 : vector<24x32xf32>
    %cst_15 = arith.constant 1.000000e+00 : f32
    %19 = vector.broadcast %cst_15 : f32 to vector<24x1xf32>
    %20 = arith.subf %19, %10 : vector<24x1xf32>
    %21 = vector.broadcast %20 : vector<24x1xf32> to vector<24x32xf32>
    %22 = arith.mulf %16, %21 : vector<24x32xf32>
    %23 = arith.addf %18, %22 : vector<24x32xf32>
    %24 = tpu.concatenate %3, %16, %23 in 0 : vector<24x32xf32>, vector<24x32xf32>, vector<24x32xf32> -> vector<72x32xf32>
    %cst_16 = arith.constant dense<0.000000e+00> : vector<72x32xf32>
    %25 = tpu.matmul %24, %4, %cst_16 {dimension_numbers = #tpu.dot_dimension_numbers<[1], [0], [0], [1], [0, 0, 1, 1], [], []>} : vector<72x32xf32>, vector<32x32xf32>, vector<72x32xf32> -> vector<72x32xf32>
    %26 = vector.broadcast %5 : vector<1x32xf32> to vector<72x32xf32>
    %27 = arith.addf %25, %26 : vector<72x32xf32>
    %cst_17 = arith.constant 0.000000e+00 : f32
    %28 = vector.broadcast %cst_17 : f32 to vector<72x32xf32>
    %29 = arith.maximumf %27, %28 : vector<72x32xf32>
    %30 = vector.broadcast %6 : vector<1x32xf32> to vector<72x32xf32>
    %31 = arith.mulf %29, %30 : vector<72x32xf32>
    %cst_18 = arith.constant dense<0.000000e+00> : vector<72xf32>
    %32 = vector.multi_reduction <add>, %31, %cst_18 [1] : vector<72x32xf32> to vector<72xf32>
    %33 = vector.shape_cast %32 : vector<72xf32> to vector<72x1xf32>
    %34 = vector.broadcast %7 : vector<1x1xf32> to vector<72x1xf32>
    %35 = arith.addf %33, %34 : vector<72x1xf32>
    %36 = math.tanh %35 : vector<72x1xf32>
    %37 = vector.extract_strided_slice %29 {offsets = [0, 0], sizes = [24, 32], strides = [1, 1]} : vector<72x32xf32> to vector<24x32xf32>
    %38 = vector.extract_strided_slice %36 {offsets = [0, 0], sizes = [24, 1], strides = [1, 1]} : vector<72x1xf32> to vector<24x1xf32>
    %39 = vector.extract_strided_slice %36 {offsets = [24, 0], sizes = [24, 1], strides = [1, 1]} : vector<72x1xf32> to vector<24x1xf32>
    %40 = vector.extract_strided_slice %36 {offsets = [48, 0], sizes = [24, 1], strides = [1, 1]} : vector<72x1xf32> to vector<24x1xf32>
    %41 = vector.extract_strided_slice %37 {offsets = [0, 0], sizes = [8, 32], strides = [1, 1]} : vector<24x32xf32> to vector<8x32xf32>
    %42 = vector.extract_strided_slice %37 {offsets = [8, 0], sizes = [8, 32], strides = [1, 1]} : vector<24x32xf32> to vector<8x32xf32>
    %43 = vector.extract_strided_slice %37 {offsets = [16, 0], sizes = [8, 32], strides = [1, 1]} : vector<24x32xf32> to vector<8x32xf32>
    %44 = arith.subf %41, %42 : vector<8x32xf32>
    %cst_19 = arith.constant 9.99999997E-7 : f32
    %45 = vector.broadcast %cst_19 : f32 to vector<8x32xf32>
    %46 = arith.addf %44, %45 : vector<8x32xf32>
    %47 = arith.mulf %46, %46 : vector<8x32xf32>
    %cst_20 = arith.constant dense<0.000000e+00> : vector<8xf32>
    %48 = vector.multi_reduction <add>, %47, %cst_20 [1] : vector<8x32xf32> to vector<8xf32>
    %49 = vector.shape_cast %48 : vector<8xf32> to vector<8x1xf32>
    %50 = math.sqrt %49 : vector<8x1xf32>
    %51 = arith.subf %41, %43 : vector<8x32xf32>
    %cst_21 = arith.constant 9.99999997E-7 : f32
    %52 = vector.broadcast %cst_21 : f32 to vector<8x32xf32>
    %53 = arith.addf %51, %52 : vector<8x32xf32>
    %54 = arith.mulf %53, %53 : vector<8x32xf32>
    %cst_22 = arith.constant dense<0.000000e+00> : vector<8xf32>
    %55 = vector.multi_reduction <add>, %54, %cst_22 [1] : vector<8x32xf32> to vector<8xf32>
    %56 = vector.shape_cast %55 : vector<8xf32> to vector<8x1xf32>
    %57 = math.sqrt %56 : vector<8x1xf32>
    %58 = arith.subf %50, %57 : vector<8x1xf32>
    %cst_23 = arith.constant 1.000000e+00 : f32
    %59 = vector.broadcast %cst_23 : f32 to vector<8x1xf32>
    %60 = arith.addf %58, %59 : vector<8x1xf32>
    %cst_24 = arith.constant 0.000000e+00 : f32
    %61 = vector.broadcast %cst_24 : f32 to vector<8x1xf32>
    %62 = arith.maximumf %60, %61 : vector<8x1xf32>
    %63 = vector.shape_cast %62 : vector<8x1xf32> to vector<1x8x1xf32>
    %cst_25 = arith.constant dense<0.000000e+00> : vector<1xf32>
    %64 = vector.multi_reduction <add>, %63, %cst_25 [1, 2] : vector<1x8x1xf32> to vector<1xf32>
    %65 = vector.shape_cast %64 : vector<1xf32> to vector<1x1x1xf32>
    %66 = vector.extract %65[0, 0, 0] : f32 from vector<1x1x1xf32>
    %cst_26 = arith.constant 8.000000e+00 : f32
    %67 = arith.divf %66, %cst_26 : f32
    %68 = arith.addf %41, %42 : vector<8x32xf32>
    %69 = arith.addf %68, %43 : vector<8x32xf32>
    %70 = arith.mulf %69, %69 : vector<8x32xf32>
    %71 = vector.shape_cast %70 : vector<8x32xf32> to vector<1x8x32xf32>
    %cst_27 = arith.constant dense<0.000000e+00> : vector<1xf32>
    %72 = vector.multi_reduction <add>, %71, %cst_27 [1, 2] : vector<1x8x32xf32> to vector<1xf32>
    %73 = vector.shape_cast %72 : vector<1xf32> to vector<1x1x1xf32>
    %74 = vector.extract %73[0, 0, 0] : f32 from vector<1x1x1xf32>
    %75 = math.sqrt %74 : f32
    %76 = tpu.iota {dimensions = array<i32: 0>} : vector<24x1xi32>
    %c16_i32 = arith.constant 16 : i32
    %77 = vector.broadcast %c16_i32 : i32 to vector<24x1xi32>
    %78 = arith.cmpi slt, %76, %77 : vector<24x1xi32>
    %cst_28 = arith.constant -1.000000e+00 : f32
    %cst_29 = arith.constant 1.000000e+00 : f32
    %79 = vector.broadcast %cst_28 : f32 to vector<24x1xf32>
    %80 = vector.broadcast %cst_29 : f32 to vector<24x1xf32>
    %81 = arith.select %78, %79, %80 : vector<24x1xi1>, vector<24x1xf32>
    %c16_i32_30 = arith.constant 16 : i32
    %82 = vector.broadcast %c16_i32_30 : i32 to vector<24x1xi32>
    %83 = arith.cmpi slt, %9, %82 : vector<24x1xi32>
    %cst_31 = arith.constant -1.000000e+00 : f32
    %cst_32 = arith.constant 1.000000e+00 : f32
    %84 = vector.broadcast %cst_31 : f32 to vector<24x1xf32>
    %85 = vector.broadcast %cst_32 : f32 to vector<24x1xf32>
    %86 = arith.select %83, %84, %85 : vector<24x1xi1>, vector<24x1xf32>
    %87 = arith.mulf %81, %10 : vector<24x1xf32>
    %cst_33 = arith.constant 1.000000e+00 : f32
    %88 = vector.broadcast %cst_33 : f32 to vector<24x1xf32>
    %89 = arith.subf %88, %10 : vector<24x1xf32>
    %90 = arith.mulf %86, %89 : vector<24x1xf32>
    %91 = arith.addf %87, %90 : vector<24x1xf32>
    %92 = arith.mulf %38, %10 : vector<24x1xf32>
    %cst_34 = arith.constant 1.000000e+00 : f32
    %93 = vector.broadcast %cst_34 : f32 to vector<24x1xf32>
    %94 = arith.subf %93, %10 : vector<24x1xf32>
    %95 = arith.mulf %39, %94 : vector<24x1xf32>
    %96 = arith.addf %92, %95 : vector<24x1xf32>
    %97 = arith.subf %40, %91 : vector<24x1xf32>
    %98 = math.absf %97 : vector<24x1xf32>
    %cst_35 = arith.constant 1.000000e+00 : f32
    %99 = vector.broadcast %cst_35 : f32 to vector<24x1xf32>
    %100 = arith.cmpf olt, %98, %99 : vector<24x1xf32>
    %cst_36 = arith.constant 5.000000e-01 : f32
    %101 = vector.broadcast %cst_36 : f32 to vector<24x1xf32>
    %102 = arith.mulf %101, %97 : vector<24x1xf32>
    %103 = arith.mulf %102, %97 : vector<24x1xf32>
    %cst_37 = arith.constant 5.000000e-01 : f32
    %104 = vector.broadcast %cst_37 : f32 to vector<24x1xf32>
    %105 = arith.subf %98, %104 : vector<24x1xf32>
    %106 = arith.select %100, %103, %105 : vector<24x1xi1>, vector<24x1xf32>
    %107 = vector.shape_cast %106 : vector<24x1xf32> to vector<1x24x1xf32>
    %cst_38 = arith.constant dense<0.000000e+00> : vector<1xf32>
    %108 = vector.multi_reduction <add>, %107, %cst_38 [1, 2] : vector<1x24x1xf32> to vector<1xf32>
    %109 = vector.shape_cast %108 : vector<1xf32> to vector<1x1x1xf32>
    %110 = vector.extract %109[0, 0, 0] : f32 from vector<1x1x1xf32>
    %cst_39 = arith.constant 2.400000e+01 : f32
    %111 = arith.divf %110, %cst_39 : f32
    %112 = arith.subf %40, %96 : vector<24x1xf32>
    %113 = math.absf %112 : vector<24x1xf32>
    %cst_40 = arith.constant 1.000000e+00 : f32
    %114 = vector.broadcast %cst_40 : f32 to vector<24x1xf32>
    %115 = arith.cmpf olt, %113, %114 : vector<24x1xf32>
    %cst_41 = arith.constant 5.000000e-01 : f32
    %116 = vector.broadcast %cst_41 : f32 to vector<24x1xf32>
    %117 = arith.mulf %116, %112 : vector<24x1xf32>
    %118 = arith.mulf %117, %112 : vector<24x1xf32>
    %cst_42 = arith.constant 5.000000e-01 : f32
    %119 = vector.broadcast %cst_42 : f32 to vector<24x1xf32>
    %120 = arith.subf %113, %119 : vector<24x1xf32>
    %121 = arith.select %115, %118, %120 : vector<24x1xi1>, vector<24x1xf32>
    %122 = vector.shape_cast %121 : vector<24x1xf32> to vector<1x24x1xf32>
    %cst_43 = arith.constant dense<0.000000e+00> : vector<1xf32>
    %123 = vector.multi_reduction <add>, %122, %cst_43 [1, 2] : vector<1x24x1xf32> to vector<1xf32>
    %124 = vector.shape_cast %123 : vector<1xf32> to vector<1x1x1xf32>
    %125 = vector.extract %124[0, 0, 0] : f32 from vector<1x1x1xf32>
    %cst_44 = arith.constant 2.400000e+01 : f32
    %126 = arith.divf %125, %cst_44 : f32
    %c0_45 = arith.constant 0 : index
    %127 = memref.load %arg6[%c0_45] : memref<4xf32, #tpu.memory_space<smem>>
    memref.store %67, %arg6[%c0_45] : memref<4xf32, #tpu.memory_space<smem>>
    %c1_46 = arith.constant 1 : index
    %128 = memref.load %arg6[%c1_46] : memref<4xf32, #tpu.memory_space<smem>>
    memref.store %75, %arg6[%c1_46] : memref<4xf32, #tpu.memory_space<smem>>
    %c2_47 = arith.constant 2 : index
    %129 = memref.load %arg6[%c2_47] : memref<4xf32, #tpu.memory_space<smem>>
    memref.store %111, %arg6[%c2_47] : memref<4xf32, #tpu.memory_space<smem>>
    %c3 = arith.constant 3 : index
    %130 = memref.load %arg6[%c3] : memref<4xf32, #tpu.memory_space<smem>>
    memref.store %126, %arg6[%c3] : memref<4xf32, #tpu.memory_space<smem>>
    return
  }
}

</mosaic_0001>

<bundles_post_ra>
// kernel: tpu_custom_call.1
= control target key start
LH: loop header
LB: loop body
LE: loop exit
PB: predicated region body
PF: predicated region fallthrough
CT: control target
= control target key end

     0   :  { %11 = vsyncpa [#allocation3], 0  ;;  %s1232_s0 = inlined_call_operand.hbm [shape: f32[8,32], index: 0, kind: input, shape index: {}]   ;;  %s1233_s1 = inlined_call_operand.hbm [shape: f32[8,32], index: 1, kind: input, shape index: {}]   ;;  %s1234_s2 = inlined_call_operand.hbm [shape: f32[8,32], index: 2, kind: input, shape index: {}]   ;;  %s1235_s3 = inlined_call_operand.vmem [shape: f32[32,32], index: 3, kind: input, shape index: {}]   ;;  %s1236_s4 = inlined_call_operand.vmem [shape: f32[3,32], index: 4, kind: input, shape index: {}]   ;;  %s1237_s5 = inlined_call_operand.vmem [shape: f32[24,2], index: 5, kind: input, shape index: {}]   ;;  %s1238_s6 = inlined_call_operand.hbm [shape: f32[4], index: 6, kind: output, shape index: {}]  }
   0x1   :  { %12 = vsyncpa [#allocation6], 0 }
   0x2   :  { %13 = vsyncpa [#allocation4], 0  ;;  %s924_s21 = smov [#allocation5]   ;;  %s925_s23 = smov [#allocation2]  }
   0x3   :  { %s30_s22 = sshll.u32 %s924_s21, 4  ;;  %s20_s24 = sshll.u32 %s925_s23, 4  ;;  %s31_s22 = int_to_ptr.vmem [resolvable:$true] %s30_s22  ;;  %s21_s24 = int_to_ptr.vmem [resolvable:$true] %s20_s24 }
   0x4   :  { %s842_s27 = scalar_lea.hbm %s1233_s1, 128 }
   0x5   :  { %p843_p0 = scmp.ne.s32.totalorder %s1233_s1, %s842_s27  ;;  %p846_p1 = scmp.lt.u32.totalorder %s842_s27, %s1233_s1 }
   0x7   :  { %p848_p2 = pnand %p846_p1, %p843_p0 }
   0x9   :  { %851 = shalt.err (!%p848_p2)
}
   0xa   :  { %s852_s8 = scalar_lea.vmem %s31_s22, 128  ;;  %p857_p4 = scmp.lt.s32.totalorder %s31_s22, %s31_s22 }
   0xb   :  { %p853_p3 = scmp.ne.s32.totalorder %s31_s22, %s852_s8  ;;  %p858_p5 = scmp.lt.s32.totalorder %s852_s8, %s852_s8 }
   0xd   :  { %p859_p6 = por %p858_p5, %p857_p4 }
   0xf   :  { %p860_p7 = pnand %p859_p6, %p853_p3 }
  0x11   :  { %863 = shalt.err (!%p860_p7)
}
  0x12   :  { %33 = dma.hbm_to_vmem [thread:$0]  %s1233_s1, 128, %s31_s22, [#allocation6]  }
  0x13   :  { %s864_s13 = scalar_lea.hbm %s1232_s0, 128 }
  0x14   :  { %p865_p8 = scmp.ne.s32.totalorder %s1232_s0, %s864_s13  ;;  %p868_p9 = scmp.lt.u32.totalorder %s864_s13, %s1232_s0 }
  0x16   :  { %p870_p10 = pnand %p868_p9, %p865_p8 }
  0x18   :  { %873 = shalt.err (!%p870_p10)
}
  0x19   :  { %s874_s18 = scalar_lea.vmem %s21_s24, 128  ;;  %p879_p12 = scmp.lt.s32.totalorder %s21_s24, %s21_s24 }
  0x1a   :  { %p875_p11 = scmp.ne.s32.totalorder %s21_s24, %s874_s18  ;;  %p880_p13 = scmp.lt.s32.totalorder %s874_s18, %s874_s18 }
  0x1c   :  { %p881_p0 = por %p880_p13, %p879_p12 }
  0x1e   :  { %p882_p1 = pnand %p881_p0, %p875_p11 }
  0x20   :  { %885 = shalt.err (!%p882_p1)
}
  0x21   :  { %23 = dma.hbm_to_vmem [thread:$0]  %s1232_s0, 128, %s21_s24, [#allocation3]  }
  0x22   :  { %s926_s20 = smov [#allocation7]   ;;  %s886_s25 = scalar_lea.hbm %s1234_s2, 128 }
  0x23   :  { %s40_s21 = sshll.u32 %s926_s20, 4  ;;  %p887_p2 = scmp.ne.s32.totalorder %s1234_s2, %s886_s25  ;;  %s41_s21 = int_to_ptr.vmem [resolvable:$true] %s40_s21 }
  0x24   :  { %p890_p3 = scmp.lt.u32.totalorder %s886_s25, %s1234_s2 }
  0x26   :  { %p892_p4 = pnand %p890_p3, %p887_p2 }
  0x28   :  { %895 = shalt.err (!%p892_p4)
}
  0x29   :  { %s896_s30 = scalar_lea.vmem %s41_s21, 128  ;;  %p901_p6 = scmp.lt.s32.totalorder %s41_s21, %s41_s21 }
  0x2a   :  { %p897_p5 = scmp.ne.s32.totalorder %s41_s21, %s896_s30  ;;  %p902_p7 = scmp.lt.s32.totalorder %s896_s30, %s896_s30 }
  0x2c   :  { %p903_p8 = por %p902_p7, %p901_p6 }
  0x2e   :  { %p904_p9 = pnand %p903_p8, %p897_p5 }
  0x30   :  { %907 = shalt.err (!%p904_p9)
}
  0x31   :  { %43 = dma.hbm_to_vmem [thread:$0]  %s1234_s2, 128, %s41_s21, [#allocation6]  }
  0x32   :  { %918 = dma.done.wait [#allocation3], 128  }
  0x33   :  { %919 = vsyncadd [#allocation3], 4294967168 }
  0x34   :  { %920 = dma.done.wait [#allocation6], 256  }
  0x35   :  { %921 = vsyncadd [#allocation6], 4294967040  ;;  %v927_v0 = vmov 0   ;;  %v928_v1 = vmov 0.0|0.0   ;;  %v1012_v2 = vld [vmem:[%s1237_s5] sm:$0xff]  ;;  %v1017_v3 = vld [vmem:[%s1237_s5 + $0x8] sm:$0xff]  ;;  %v75_v26 = vlaneseq }
  0x36   :  { %814 = vset.pattern.permute.xlu0 %v927_v0  ;;  %815 = vset.pattern.permute.xlu1 %v927_v0  ;;  %v1022_v4 = vld [vmem:[%s1237_s5 + $0x10] sm:$0xff]  ;;  %v786_v5 = vtrunc.f32 %v1012_v2  ;;  %v788_v6 = vtrunc.f32 %v1017_v3  ;;  %v1027_v8 = vld [vmem:[#allocation2] sm:$0xff]  ;;  %v1029_v9 = vld [vmem:[#allocation5] sm:$0xff]  ;;  %v929_v15 = vmov 0.0   ;;  %vm930_vm0 = vmmov 0   ;;  %s934_s1 = smov 1  }
  0x37   :  { %773 = vmatprep.subr.bf16.mxu0 %v928_v1  ;;  %782 = vmatprep.subr.bf16.mxu1 %v928_v1  ;;  %v790_v7 = vtrunc.f32 %v1022_v4  ;;  %v774_v10 = vpack.c.bf16 %v1029_v9, %v1027_v8  ;;  %v1041_v14 = vld [vmem:[#allocation7] sm:$0xff]  ;;  %v62_v16 = vld [vmem:[%s1235_s3] sm:$0xff]  ;;  %v63_v17 = vld [vmem:[%s1235_s3 + $0x8] sm:$0xff]  ;;  %v203_v21 = vsub.f32 1.0, %v1012_v2  ;;  %v931_v23 = vmov 1   ;;  %s908_s9 = scalar_lea.hbm %s1238_s6, 16 }
  0x38   :  { %v1033_v11 = vcvt.f32.s32 %v786_v5  ;;  %v1038_v13 = vcvt.f32.s32 %v788_v6  ;;  %729 = vmatprep.mubr.msk.f32.mxu0 %vm930_vm0, %v929_v15  ;;  %755 = vmatprep.mubr.msk.f32.mxu1 %vm930_vm0, %v929_v15  ;;  %v777_v18 = vpack.c.bf16 %v63_v17, %v62_v16  ;;  %v64_v19 = vld [vmem:[%s1235_s3 + $0x10] sm:$0xff]  ;;  %v65_v20 = vld [vmem:[%s1235_s3 + $0x18] sm:$0xff]  ;;  %v204_v24 = vsub.f32 1.0, %v1017_v3  ;;  %s932_s3 = smov 127   ;;  %v1127_v0 = vld [vmem:[%s1236_s4] ss:$0 sm:$0xff]  ;;  %p909_p10 = scmp.ne.s32.totalorder %s1238_s6, %s908_s9 }
  0x39   :  { %v1035_v12 = vcvt.f32.s32 %v790_v7  ;;  %775 = vmatpush3.bf16.msra.mxu0 %v774_v10  ;;  %v780_v22 = vpack.c.bf16 %v65_v20, %v64_v19  ;;  %v205_v25 = vsub.f32 1.0, %v1022_v4  ;;  %v76_v27 = vand.u32 127, %v75_v26  ;;  %p912_p11 = scmp.lt.u32.totalorder %s908_s9, %s1238_s6 }
  0x3a   :  { %78 = vperm.xlu0 %814, %v1033_v11   ;;  %727 = vmatprep.subr.mxu0 %v929_v15  ;;  %vm95_vm1 = vcmask 195584   ;;  %vm231_vm5 = vcmask 261120   ;;  %vm515_vm6 = vcmp.lt.s32.totalorder %v1033_v11, 16  ;;  %v933_v37 = vmov 1.0  }
  0x3b   :  { %84 = vperm.xlu1 %815, %v1035_v12   ;;  %784 = vmatpush3.bf16.msra.mxu1 %v777_v18  ;;  %v518_v38 = vsel %vm515_vm6, -1.0, %v933_v37  ;;  %vm517_vm7 = vcmp.lt.s32.totalorder %v1035_v12, 16  ;;  %vm516_vm8 = vcmp.lt.s32.totalorder %v1038_v13, 16  ;;  %vm469_vm13 = vcmask 7168   ;;  %p914_p12 = pnand %p912_p11, %p909_p10 }
  0x3c   :  { %783 = vmatprep.subr.bf16.mxu1 %v928_v1  ;;  %v519_v45 = vsel %vm516_vm8, -1.0, %v933_v37  ;;  %v520_v46 = vsel %vm517_vm7, -1.0, %v933_v37 }
  0x3d   :  { %728 = vmatpush3.msra.mxu0 %v1041_v14 }
  0x3e   :  { %81 = vperm.xlu0 %814, %v1038_v13   ;;  %776 = vmatprep.subr.bf16.mxu0 %v928_v1 }
  0x3f   :  { %816 = vset.pattern.permute.xlu1 %v931_v23  ;;  %785 = vmatpush3.bf16.msra.mxu1 %v780_v22 }
  0x40   :  { %187 = vperm.xlu1 %816, %v1012_v2  }
  0x42   :  { %817 = vset.pattern.permute.xlu0 %v931_v23 }
  0x43   :  { %208 = vperm.xlu0 %817, %v203_v21  }
  0x44   :  { %192 = vperm.xlu1 %816, %v1017_v3  }
  0x47   :  { %197 = vperm.xlu0 %817, %v1022_v4  }
  0x48   :  { %213 = vperm.xlu1 %816, %v204_v24  }
  0x4b   :  { %524 = vrot.lane.b32.xlu0 %v203_v21, %s932_s3 }
  0x4c   :  { %218 = vperm.xlu1 %816, %v205_v25  }
  0x4f   :  { %528 = vrot.lane.b32.xlu0 %v205_v25, %s932_s3 }
  0x50   :  { %526 = vrot.lane.b32.xlu1 %v204_v24, %s932_s3 }
  0x53   :  { %551 = vrot.lane.b32.xlu0 %v1012_v2, %s932_s3 }
  0x54   :  { %553 = vrot.lane.b32.xlu1 %v1017_v3, %s932_s3 }
  0xb9   :  { %v79_v28 = vpop.permute.xlu0 %78 }
  0xba   :  { %vm86_vm2 = vcmp.eq.s32.totalorder %v76_v27, %v79_v28  ;;  %v85_v30 = vpop.permute.xlu1 %84 }
  0xbb   :  { %v680_v29 = vsel %vm86_vm2, 1.0, %v929_v15  ;;  %vm88_vm4 = vcmp.eq.s32.totalorder %v76_v27, %v85_v30 }
  0xbc   :  { %730 = vmatmul.mubr.msk.f32.vlgmr.msra.gmra.mrb[0].mxu0 %vm95_vm1, %v680_v29  ;;  %v682_v33 = vsel %vm88_vm4, 1.0, %v929_v15 }
  0xbd   :  { %v82_v31 = vpop.permute.xlu0 %81  ;;  %732 = vmatprep.mubr.msk.f32.mxu0 %vm930_vm0, %v929_v15  ;;  %778 = vmatpush3.bf16.msra.mxu0 %v777_v18 }
  0xbe   :  { %vm87_vm3 = vcmp.eq.s32.totalorder %v76_v27, %v82_v31  ;;  %779 = vmatprep.subr.bf16.mxu0 %v928_v1 }
  0xbf   :  { %v681_v32 = vsel %vm87_vm3, 1.0, %v929_v15  ;;  %v188_v39 = vpop.permute.xlu1 %187 }
  0xc0   :  { %733 = vmatmul.mubr.msk.f32.gmra.mrb[2].mxu0 %vm95_vm1, %v681_v32  ;;  %v200_v50 = vmul.f32 %v188_v39, %v1027_v8 }
  0xc1   :  { %735 = vmatprep.mubr.msk.f32.mxu0 %vm930_vm0, %v929_v15  ;;  %781 = vmatpush3.bf16.msra.mxu0 %v780_v22 }
  0xc2   :  { %v209_v34 = vpop.permute.xlu0 %208 }
  0xc3   :  { %v193_v41 = vpop.permute.xlu1 %192 }
  0xc4   :  { %736 = vmatmul.mubr.msk.f32.gmra.mrb[4].mxu0 %vm95_vm1, %v682_v33  ;;  %v201_v54 = vmul.f32 %v193_v41, %v1029_v9  ;;  %v521_v33 = vmul.f32 -1.0, %v1012_v2 }
  0xc5   :  { %746 = vmatprep.mubr.msk.f32.mxu0 %vm930_vm0, %v929_v15 }
  0xc6   :  { %v198_v35 = vpop.permute.xlu0 %197 }
  0xc7   :  { %v214_v42 = vpop.permute.xlu1 %213  ;;  %v202_v59 = vmul.f32 %v198_v35, %v1041_v14 }
  0xc8   :  { %747 = vmatmul.mubr.msk.f32.vlgmr.msra.gmra.mrb[6].mxu0 %vm231_vm5, %v1027_v8  ;;  %v1136_v8 = vld [vmem:[%s1236_s4 + $0x1] ss:$0 sm:$0xff] }
  0xc9   :  { %749 = vmatprep.mubr.msk.f32.mxu0 %vm930_vm0, %v929_v15 }
  0xca   :  { %v1101_v36 = vpop.permute.xlu0 %524 }
  0xcb   :  { %v533_v40 = vmul.f32 %v1101_v36, %v518_v38  ;;  %v219_v43 = vpop.permute.xlu1 %218 }
  0xcc   :  { %750 = vmatmul.mubr.msk.f32.gmra.mrb[8].mxu0 %vm231_vm5, %v1029_v9 }
  0xcd   :  { %752 = vmatprep.mubr.msk.f32.mxu0 %vm930_vm0, %v929_v15  ;;  %539 = vrot.lane.b32.xlu0 %v533_v40, %s934_s1 }
  0xce   :  { %v1108_v47 = vpop.permute.xlu0 %528 }
  0xcf   :  { %v1106_v44 = vpop.permute.xlu1 %526  ;;  %v535_v49 = vmul.f32 %v1108_v47, %v520_v46 }
  0xd0   :  { %753 = vmatmul.mubr.msk.f32.gmra.mrb[10].mxu0 %vm231_vm5, %v1041_v14  ;;  %v534_v48 = vmul.f32 %v1106_v44, %v519_v45 }
  0xd2   :  { %541 = vrot.lane.b32.xlu1 %v534_v48, %s934_s1  ;;  %v1152_v32 = vpop.permute.xlu0 %551 }
  0xd6   :  { %543 = vrot.lane.b32.xlu1 %v535_v49, %s934_s1 }
 0x18f   :  { %v171_v51 = vpop.f32.mrb[0].mxu0 }
 0x190   :  { %v221_v52 = vmul.f32 %v209_v34, %v171_v51  ;;  %v731_v53 = vpop.f32.mrb[1].mxu0  ;;  %756 = vmatmul.mubr.msk.f32.vlgmr.msra.gmra.mrb[0].mxu1 %vm231_vm5, %v171_v51  ;;  %v540_v34 = vpop.permute.xlu0 %539 }
 0x191   :  { %758 = vmatprep.mubr.msk.f32.mxu1 %vm930_vm0, %v929_v15  ;;  %v548_v35 = vadd.f32 %v540_v34, %v521_v33 }
 0x192   :  { %v224_v55 = vadd.f32 %v221_v52, %v200_v50 }
 0x193   :  { %v176_v56 = vpop.f32.mrb[2].mxu0 }
 0x194   :  { %v222_v57 = vmul.f32 %v214_v42, %v176_v56  ;;  %v734_v58 = vpop.f32.mrb[3].mxu0  ;;  %759 = vmatmul.mubr.msk.f32.gmra.mrb[2].mxu1 %vm231_vm5, %v176_v56 }
 0x195   :  { %761 = vmatprep.mubr.msk.f32.mxu1 %vm930_vm0, %v929_v15 }
 0x196   :  { %v225_v60 = vadd.f32 %v222_v57, %v201_v54 }
 0x197   :  { %v181_v61 = vpop.f32.mrb[4].mxu0 }
 0x198   :  { %v223_v62 = vmul.f32 %v219_v43, %v181_v61  ;;  %v737_v63 = vpop.f32.mrb[5].mxu0  ;;  %762 = vmatmul.mubr.msk.f32.gmra.mrb[4].mxu1 %vm231_vm5, %v181_v61 }
 0x199   :  { %764 = vmatprep.mubr.msk.f32.mxu1 %vm930_vm0, %v929_v15  ;;  %v1170_v63 = vpop.permute.xlu1 %553 }
 0x19a   :  { %v226_v1 = vadd.f32 %v223_v62, %v202_v59 }
 0x19b   :  { %v325_v5 = vpop.f32.mrb[6].mxu0 }
 0x19c   :  { %765 = vmatmul.mubr.msk.f32.gmra.mrb[6].mxu1 %vm231_vm5, %v224_v55  ;;  %v326_v6 = vadd.f32 %v1127_v0, %v325_v5  ;;  %v748_v7 = vpop.f32.mrb[7].mxu0 }
 0x19d   :  { %767 = vmatprep.mubr.msk.f32.mxu1 %vm930_vm0, %v929_v15 }
 0x19e   :  { %v369_v9 = vmax.f32 %v326_v6, 0.0 }
 0x19f   :  { %v330_v10 = vpop.f32.mrb[8].mxu0 }
 0x1a0   :  { %768 = vmatmul.mubr.msk.f32.gmra.mrb[8].mxu1 %vm231_vm5, %v225_v60  ;;  %v382_v11 = vmul.f32 %v1136_v8, %v369_v9  ;;  %v331_v12 = vadd.f32 %v1127_v0, %v330_v10  ;;  %v751_v13 = vpop.f32.mrb[9].mxu0 }
 0x1a1   :  { %770 = vmatprep.mubr.msk.f32.mxu1 %vm930_vm0, %v929_v15 }
 0x1a2   :  { %v391_v14 = vsel %vm231_vm5, %v382_v11, 0.0  ;;  %v370_v16 = vmax.f32 %v331_v12, 0.0 }
 0x1a3   :  { %392 = vadd.xlane.f32.xlu0 %v391_v14  ;;  %v335_v17 = vpop.f32.mrb[10].mxu0  ;;  %v542_v14 = vpop.permute.xlu1 %541 }
 0x1a4   :  { %771 = vmatmul.mubr.msk.f32.gmra.mrb[10].mxu1 %vm231_vm5, %v226_v1  ;;  %v383_v18 = vmul.f32 %v1136_v8, %v370_v16  ;;  %v440_v19 = vsub.f32 %v369_v9, %v370_v16  ;;  %v336_v20 = vadd.f32 %v1127_v0, %v335_v17  ;;  %v754_v21 = vpop.f32.mrb[11].mxu0  ;;  %v483_v29 = vadd.f32 %v370_v16, %v369_v9 }
 0x1a6   :  { %v394_v22 = vsel %vm231_vm5, %v383_v18, 0.0  ;;  %v441_v23 = vadd.f32 1e-06, %v440_v19  ;;  %v371_v24 = vmax.f32 %v336_v20, 0.0 }
 0x1a7   :  { %395 = vadd.xlane.f32.xlu1 %v394_v22  ;;  %v544_v20 = vpop.permute.xlu1 %543 }
 0x1a8   :  { %v442_v25 = vmul.f32 %v441_v23, %v441_v23  ;;  %v453_v15 = vsub.f32 %v369_v9, %v371_v24  ;;  %v1150_v31 = vadd.f32 %v483_v29, %v371_v24  ;;  %v384_v37 = vmul.f32 %v1136_v8, %v371_v24 }
 0x1a9   :  { %v522_v23 = vmul.f32 -1.0, %v1017_v3 }
 0x1aa   :  { %v443_v26 = vsel %vm231_vm5, %v442_v25, 0.0  ;;  %v454_v27 = vadd.f32 1e-06, %v453_v15  ;;  %v397_v38 = vsel %vm231_vm5, %v384_v37, 0.0  ;;  %v550_v15 = vadd.f32 %v544_v20, %v1022_v4 }
 0x1ab   :  { %444 = vadd.xlane.f32.xlu1 %v443_v26  ;;  %v549_v25 = vadd.f32 %v542_v14, %v522_v23 }
 0x1ac   :  { %v455_v28 = vmul.f32 %v454_v27, %v454_v27 }
 0x1ae   :  { %v456_v30 = vsel %vm231_vm5, %v455_v28, 0.0 }
 0x1af   :  { %457 = vadd.xlane.f32.xlu0 %v456_v30 }
 0x1bc   :  { %555 = vrot.lane.b32.xlu1 %v1022_v4, %s932_s3 }
 0x1c5   :  { %572 = vrot.lane.b32.xlu0 %v548_v35, %s932_s3 }
 0x1e0   :  { %398 = vadd.xlane.f32.xlu1 %v397_v38  ;;  %v485_v38 = vmul.f32 %v1150_v31, %v1150_v31 }
 0x230   :  { %v393_v22 = vpop.xlane.xlu0 %392 }
 0x234   :  { %v396_v21 = vpop.xlane.xlu1 %395 }
 0x238   :  { %v445_v24 = vpop.xlane.xlu1 %444 }
 0x239   :  { %818 = vrsqrt.f32 %v445_v24  ;;  %vm448_vm9 = vcmp.eq.f32.partialorder %v445_v24, inf  ;;  %v451_v29 = vand.u32 2147483648, %v445_v24  ;;  %vm450_vm11 = vcmp.eq.f32.partialorder %v445_v24, 0.0 }
 0x263   :  { %v340_v39 = vpop.f32.mrb[0].mxu1 }
 0x264   :  { %v341_v40 = vadd.f32 %v1127_v0, %v340_v39  ;;  %v757_v41 = vpop.f32.mrb[1].mxu1 }
 0x266   :  { %v372_v42 = vmax.f32 %v341_v40, 0.0  ;;  %v486_v40 = vsel %vm231_vm5, %v485_v38, 0.0 }
 0x267   :  { %v345_v43 = vpop.f32.mrb[2].mxu1 }
 0x268   :  { %v346_v45 = vadd.f32 %v1127_v0, %v345_v43  ;;  %v760_v46 = vpop.f32.mrb[3].mxu1  ;;  %v385_v2 = vmul.f32 %v1136_v8, %v372_v42 }
 0x269   :  { %v556_v46 = vpop.permute.xlu1 %555 }
 0x26a   :  { %v373_v48 = vmax.f32 %v346_v45, 0.0  ;;  %v400_v49 = vsel %vm231_vm5, %v385_v2, 0.0  ;;  %v697_v45 = vld [vmem:[%s1236_s4 + $0x2] ss:$0 sm:$0xff] }
 0x26b   :  { %v350_v50 = vpop.f32.mrb[4].mxu1  ;;  %401 = vadd.xlane.f32.xlu0 %v400_v49  ;;  %v422_v49 = vadd.f32 %v697_v45, %v393_v22  ;;  %v423_v31 = vadd.f32 %v697_v45, %v396_v21 }
 0x26c   :  { %v351_v51 = vadd.f32 %v1127_v0, %v350_v50  ;;  %v763_v52 = vpop.f32.mrb[5].mxu1  ;;  %v386_v53 = vmul.f32 %v1136_v8, %v373_v48 }
 0x26e   :  { %v374_v54 = vmax.f32 %v351_v51, 0.0  ;;  %v403_v55 = vsel %vm231_vm5, %v386_v53, 0.0  ;;  %v399_v51 = vpop.xlane.xlu1 %398 }
 0x26f   :  { %v355_v56 = vpop.f32.mrb[6].mxu1  ;;  %404 = vadd.xlane.f32.xlu0 %v403_v55 }
 0x270   :  { %v356_v57 = vadd.f32 %v1127_v0, %v355_v56  ;;  %v766_v58 = vpop.f32.mrb[7].mxu1  ;;  %v387_v59 = vmul.f32 %v1136_v8, %v374_v54  ;;  %v424_v54 = vadd.f32 %v697_v45, %v399_v51 }
 0x272   :  { %v375_v60 = vmax.f32 %v356_v57, 0.0  ;;  %v406_v61 = vsel %vm231_vm5, %v387_v59, 0.0 }
 0x273   :  { %v360_v62 = vpop.f32.mrb[8].mxu1  ;;  %407 = vadd.xlane.f32.xlu0 %v406_v61 }
 0x274   :  { %v361_v1 = vadd.f32 %v1127_v0, %v360_v62  ;;  %v769_v5 = vpop.f32.mrb[9].mxu1  ;;  %v388_v6 = vmul.f32 %v1136_v8, %v375_v60 }
 0x276   :  { %v376_v7 = vmax.f32 %v361_v1, 0.0  ;;  %v409_v9 = vsel %vm231_vm5, %v388_v6, 0.0 }
 0x277   :  { %v365_v10 = vpop.f32.mrb[10].mxu1  ;;  %410 = vadd.xlane.f32.xlu1 %v409_v9 }
 0x278   :  { %v366_v11 = vadd.f32 %v1127_v0, %v365_v10  ;;  %v772_v12 = vpop.f32.mrb[11].mxu1  ;;  %v389_v13 = vmul.f32 %v1136_v8, %v376_v7  ;;  %v458_v0 = vpop.xlane.xlu0 %457 }
 0x279   :  { %820 = vrsqrt.f32 %v458_v0  ;;  %vm461_vm10 = vcmp.eq.f32.partialorder %v458_v0, inf  ;;  %v464_v30 = vand.u32 2147483648, %v458_v0  ;;  %vm463_vm12 = vcmp.eq.f32.partialorder %v458_v0, 0.0 }
 0x27a   :  { %v377_v16 = vmax.f32 %v366_v11, 0.0  ;;  %v412_v17 = vsel %vm231_vm5, %v389_v13, 0.0 }
 0x27b   :  { %413 = vadd.xlane.f32.xlu0 %v412_v17 }
 0x27c   :  { %v390_v18 = vmul.f32 %v1136_v8, %v377_v16  ;;  %v819_v8 = vpop.eup %818  ;;  %v573_v42 = vpop.permute.xlu0 %572 }
 0x27d   :  { %v447_v27 = vmul.f32 %v819_v8, %v445_v24 }
 0x27e   :  { %v415_v19 = vsel %vm231_vm5, %v390_v18, 0.0 }
 0x27f   :  { %416 = vadd.xlane.f32.xlu1 %v415_v19  ;;  %v449_v3 = vsel %vm448_vm9, %v445_v24, %v447_v27 }
 0x280   :  { %v452_v34 = vsel %vm450_vm11, %v451_v29, %v449_v3 }
 0x283   :  { %v821_v26 = vpop.eup %820 }
 0x284   :  { %v460_v28 = vmul.f32 %v821_v26, %v458_v0 }
 0x286   :  { %v462_v33 = vsel %vm461_vm10, %v458_v0, %v460_v28 }
 0x287   :  { %v465_v35 = vsel %vm463_vm12, %v464_v30, %v462_v33 }
 0x288   :  { %v466_v37 = vsub.f32 %v452_v34, %v465_v35 }
 0x28a   :  { %v467_v4 = vadd.f32 1.0, %v466_v37 }
 0x28c   :  { %v468_v39 = vmax.f32 %v467_v4, 0.0 }
 0x28e   :  { %v470_v41 = vsel %vm469_vm13, %v468_v39, 0.0 }
 0x290   :  { %574 = vrot.lane.b32.xlu1 %v549_v25, %s932_s3 }
 0x291   :  { %576 = vrot.lane.b32.xlu0 %v550_v15, %s932_s3 }
 0x2b0   :  { %487 = vadd.xlane.f32.xlu0 %v486_v40 }
 0x2b4   :  { %471 = vadd.xlane.f32.xlu1 %v470_v41 }
 0x2f8   :  { %v402_v43 = vpop.xlane.xlu0 %401 }
 0x2f9   :  { %v425_v2 = vadd.f32 %v697_v45, %v402_v43 }
 0x2fb   :  { %822 = vtanh.f32 %v425_v2 }
 0x2fc   :  { %v405_v48 = vpop.xlane.xlu0 %404  ;;  %824 = vtanh.f32 %v422_v49 }
 0x2fd   :  { %v426_v50 = vadd.f32 %v697_v45, %v405_v48 }
 0x2ff   :  { %826 = vtanh.f32 %v426_v50 }
 0x300   :  { %v408_v52 = vpop.xlane.xlu0 %407  ;;  %828 = vtanh.f32 %v423_v31 }
 0x301   :  { %v427_v53 = vadd.f32 %v697_v45, %v408_v52 }
 0x303   :  { %830 = vtanh.f32 %v427_v53 }
 0x304   :  { %v411_v55 = vpop.xlane.xlu1 %410 }
 0x305   :  { %v428_v56 = vadd.f32 %v697_v45, %v411_v55  ;;  %v823_v58 = vpop.eup %822 }
 0x306   :  { %v825_v60 = vpop.eup %824  ;;  %v563_v62 = vmul.f32 %v823_v58, %v1101_v36 }
 0x307   :  { %832 = vtanh.f32 %v428_v56  ;;  %v560_v7 = vmul.f32 %v825_v60, %v1152_v32 }
 0x308   :  { %834 = vtanh.f32 %v424_v54  ;;  %v414_v57 = vpop.xlane.xlu0 %413 }
 0x309   :  { %v429_v59 = vadd.f32 %v697_v45, %v414_v57  ;;  %v827_v61 = vpop.eup %826  ;;  %v566_v11 = vadd.f32 %v563_v62, %v560_v7 }
 0x30a   :  { %v829_v6 = vpop.eup %828  ;;  %v564_v9 = vmul.f32 %v827_v61, %v1106_v44 }
 0x30b   :  { %836 = vtanh.f32 %v429_v59  ;;  %v561_v13 = vmul.f32 %v829_v6, %v1170_v63 }
 0x30c   :  { %v417_v1 = vpop.xlane.xlu1 %416  ;;  %v577_v33 = vpop.permute.xlu0 %576 }
 0x30d   :  { %v430_v5 = vadd.f32 %v697_v45, %v417_v1  ;;  %v831_v10 = vpop.eup %830  ;;  %v567_v19 = vadd.f32 %v564_v9, %v561_v13 }
 0x30e   :  { %v565_v18 = vmul.f32 %v831_v10, %v1108_v47 }
 0x30f   :  { %838 = vtanh.f32 %v430_v5 }
 0x310   :  { %v575_v24 = vpop.permute.xlu1 %574 }
 0x311   :  { %v833_v12 = vpop.eup %832 }
 0x312   :  { %v835_v14 = vpop.eup %834  ;;  %v581_v16 = vsub.f32 %v833_v12, %v573_v42  ;;  %v619_v17 = vsub.f32 %v833_v12, %v566_v11 }
 0x313   :  { %v562_v32 = vmul.f32 %v835_v14, %v556_v46 }
 0x314   :  { %v622_v36 = vand.u32 2147483647, %v619_v17  ;;  %v628_v20 = vmul.f32 0.5, %v619_v17  ;;  %v584_v21 = vand.u32 2147483647, %v581_v16  ;;  %v590_v22 = vmul.f32 0.5, %v581_v16 }
 0x315   :  { %v837_v23 = vpop.eup %836  ;;  %v568_v15 = vadd.f32 %v565_v18, %v562_v32 }
 0x316   :  { %v620_v44 = vsub.f32 %v837_v23, %v567_v19  ;;  %v582_v0 = vsub.f32 %v837_v23, %v575_v24  ;;  %vm1196_vm14 = vcmp.lt.f32.partialorder %v622_v36, 1.0  ;;  %v631_v63 = vmul.f32 %v628_v20, %v619_v17 }
 0x317   :  { %v701_v8 = vadd.f32 -0.5, %v622_v36  ;;  %v593_v26 = vmul.f32 %v590_v22, %v581_v16  ;;  %v698_v27 = vadd.f32 -0.5, %v584_v21  ;;  %vm1202_vm15 = vcmp.lt.f32.partialorder %v584_v21, 1.0 }
 0x318   :  { %v585_v47 = vand.u32 2147483647, %v582_v0  ;;  %v591_v28 = vmul.f32 0.5, %v582_v0  ;;  %v623_v29 = vand.u32 2147483647, %v620_v44  ;;  %v629_v30 = vmul.f32 0.5, %v620_v44 }
 0x319   :  { %v839_v3 = vpop.eup %838  ;;  %v637_v34 = vsel %vm1196_vm14, %v631_v63, %v701_v8  ;;  %v599_v2 = vsel %vm1202_vm15, %v593_v26, %v698_v27 }
 0x31a   :  { %v583_v37 = vsub.f32 %v839_v3, %v577_v33  ;;  %v621_v4 = vsub.f32 %v839_v3, %v568_v15  ;;  %vm1206_vm0 = vcmp.lt.f32.partialorder %v585_v47, 1.0  ;;  %v594_v39 = vmul.f32 %v591_v28, %v582_v0 }
 0x31b   :  { %v699_v40 = vadd.f32 -0.5, %v585_v47  ;;  %vm626_vm1 = vcmp.lt.f32.partialorder %v623_v29, 1.0  ;;  %v632_v41 = vmul.f32 %v629_v30, %v620_v44  ;;  %v702_v42 = vadd.f32 -0.5, %v623_v29 }
 0x31c   :  { %v624_v43 = vand.u32 2147483647, %v621_v4  ;;  %v630_v45 = vmul.f32 0.5, %v621_v4  ;;  %v586_v46 = vand.u32 2147483647, %v583_v37  ;;  %v640_v49 = vsel %vm469_vm13, %v637_v34, 0.0 }
 0x31d   :  { %v638_v48 = vsel %vm626_vm1, %v632_v41, %v702_v42  ;;  %v592_v50 = vmul.f32 0.5, %v583_v37  ;;  %v600_v31 = vsel %vm1206_vm0, %v594_v39, %v699_v40  ;;  %v602_v58 = vsel %vm469_vm13, %v599_v2, 0.0 }
 0x31e   :  { %vm627_vm2 = vcmp.lt.f32.partialorder %v624_v43, 1.0  ;;  %v633_v51 = vmul.f32 %v630_v45, %v621_v4  ;;  %v703_v52 = vadd.f32 -0.5, %v624_v43  ;;  %v641_v53 = vsel %vm469_vm13, %v638_v48, 0.0 }
 0x31f   :  { %v642_v54 = vadd.f32 %v641_v53, %v640_v49  ;;  %vm589_vm3 = vcmp.lt.f32.partialorder %v586_v46, 1.0  ;;  %v595_v55 = vmul.f32 %v592_v50, %v583_v37  ;;  %v700_v56 = vadd.f32 -0.5, %v586_v46 }
 0x320   :  { %v639_v57 = vsel %vm627_vm2, %v633_v51, %v703_v52  ;;  %v603_v59 = vsel %vm469_vm13, %v600_v31, 0.0 }
 0x321   :  { %v643_v60 = vsel %vm469_vm13, %v639_v57, 0.0  ;;  %v601_v61 = vsel %vm589_vm3, %v595_v55, %v700_v56  ;;  %v604_v62 = vadd.f32 %v603_v59, %v602_v58 }
 0x322   :  { %v644_v1 = vadd.f32 %v643_v60, %v642_v54  ;;  %v605_v5 = vsel %vm469_vm13, %v601_v61, 0.0 }
 0x323   :  { %v606_v6 = vadd.f32 %v605_v5, %v604_v62 }
 0x324   :  { %645 = vadd.xlane.f32.xlu1 %v644_v1 }
 0x325   :  { %607 = vadd.xlane.f32.xlu0 %v606_v6 }
 0x33d   :  { %v488_v7 = vpop.xlane.xlu0 %487 }
 0x33e   :  { %v489_v9 = vrot.slane %v488_v7, 4 }
 0x340   :  { %v490_v10 = vadd.f32 %v489_v9, %v488_v7 }
 0x341   :  { %v472_v11 = vpop.xlane.xlu1 %471 }
 0x342   :  { %v491_v12 = vrot.slane %v490_v10, 2  ;;  %v473_v13 = vrot.slane %v472_v11, 4 }
 0x344   :  { %v474_v14 = vadd.f32 %v473_v13, %v472_v11  ;;  %v492_v16 = vadd.f32 %v491_v12, %v490_v10 }
 0x346   :  { %v475_v17 = vrot.slane %v474_v14, 2  ;;  %v493_v19 = vrot.slane %v492_v16, 1 }
 0x348   :  { %v476_v18 = vadd.f32 %v475_v17, %v474_v14  ;;  %v494_v21 = vadd.f32 %v493_v19, %v492_v16 }
 0x34a   :  { %v477_v36 = vrot.slane %v476_v18, 1 }
 0x34c   :  { %v478_v20 = vadd.f32 %v477_v36, %v476_v18 }
 0x34e   :  { %792 = vpush %v478_v20 }
 0x34f   :  { %794 = vpush %v494_v21 }
 0x37f   :  { %s793_s4 = spop %792 }
 0x380   :  { %s482_s26 = smul.f32 0.125, %s793_s4  ;;  %s795_s27 = spop %794 }
 0x381   :  { %v496_v22 = vstv %s795_s27 }
 0x382   :  { %658 = sst [smem:[#allocation8]] %s482_s26  ;;  %840 = vrsqrt.f32 %v496_v22  ;;  %vm499_vm4 = vcmp.eq.f32.partialorder %v496_v22, inf  ;;  %v502_v24 = vand.u32 2147483648, %v496_v22  ;;  %vm501_vm5 = vcmp.eq.f32.partialorder %v496_v22, 0.0 }
 0x38c   :  { %v841_v23 = vpop.eup %840 }
 0x38d   :  { %v498_v32 = vmul.f32 %v841_v23, %v496_v22 }
 0x38f   :  { %v500_v44 = vsel %vm499_vm4, %v496_v22, %v498_v32 }
 0x390   :  { %v503_v0 = vsel %vm501_vm5, %v502_v24, %v500_v44 }
 0x391   :  { %796 = vpush %v503_v0 }
 0x3b1   :  { %v646_v25 = vpop.xlane.xlu1 %645 }
 0x3b2   :  { %v608_v63 = vpop.xlane.xlu0 %607  ;;  %v647_v15 = vrot.slane %v646_v25, 4 }
 0x3b3   :  { %v609_v8 = vrot.slane %v608_v63, 4 }
 0x3b4   :  { %v648_v26 = vadd.f32 %v647_v15, %v646_v25 }
 0x3b5   :  { %v610_v27 = vadd.f32 %v609_v8, %v608_v63 }
 0x3b6   :  { %v649_v47 = vrot.slane %v648_v26, 2 }
 0x3b7   :  { %v611_v28 = vrot.slane %v610_v27, 2 }
 0x3b8   :  { %v650_v29 = vadd.f32 %v649_v47, %v648_v26 }
 0x3b9   :  { %v612_v30 = vadd.f32 %v611_v28, %v610_v27 }
 0x3ba   :  { %v651_v3 = vrot.slane %v650_v29, 1 }
 0x3bb   :  { %v613_v33 = vrot.slane %v612_v30, 1 }
 0x3bc   :  { %v652_v34 = vadd.f32 %v651_v3, %v650_v29 }
 0x3bd   :  { %v614_v35 = vadd.f32 %v613_v33, %v612_v30 }
 0x3bf   :  { %798 = vpush %v614_v35 }
 0x3c0   :  { %800 = vpush %v652_v34 }
 0x3c2   :  { %s797_s28 = spop %796 }
 0x3c3   :  { %660 = sst [smem:[#allocation8 + $0x1]] %s797_s28 }
 0x3f0   :  { %s799_s29 = spop %798 }
 0x3f1   :  { %s618_s30 = smul.f32 0.041666668, %s799_s29  ;;  %s801_s0 = spop %800 }
 0x3f2   :  { %s656_s24 = smul.f32 0.041666668, %s801_s0 }
 0x3f3   :  { %662 = sst [smem:[#allocation8 + $0x2]] %s618_s30 }
 0x3f4   :  { %664 = sst [smem:[#allocation8 + $0x3]] %s656_s24 }
 0x3f5   :  { %917 = shalt.err (!%p914_p12)
}
 0x3f6   :  { %s935_s12 = smov [#allocation8]  }
 0x3f7   :  { %672 = dma.smem_to_hbm %s935_s12, 16, %s1238_s6, [#allocation4]  }
 0x3f8   :  { %922 = dma.done.wait [#allocation4], 16  }
 0x3f9   :  { %923 = vsyncadd [#allocation4], 4294967280 }
 0x3fa   :  { %676 = sfence }
 0x3fb   :  { %677 = vsyncpa [#allocation3], 1 }
 0x3fc   :  { %678 = vsyncpa [#allocation6], 1 }
 0x3fd   :  { %679 = vsyncpa [#allocation4], 1 }

</bundles_post_ra>
